<compile_context>
chip_gen: v5e
topology: v5e:2x2
jax: 0.10.0
libtpu: 0.0.40
codegen_flags: <defaults>
</compile_context>

<pallas_src>
import functools

import jax
import jax.numpy as jnp
import numpy as np
from jax.experimental import pallas as pl
from jax.experimental.pallas import tpu as pltpu


def _cayley(w):
    """Batched Cayley map: arbitrary matrix -> orthogonal matrix (plain-JAX glue)."""
    a = w - jnp.swapaxes(w, -1, -2)                       # skew-symmetric
    eye = jnp.broadcast_to(jnp.eye(a.shape[-1], dtype=a.dtype), a.shape)
    return jnp.linalg.solve(eye + a, eye - a)             # (I + A)^-1 (I - A)


def make_flowblock_params(key, channels, depth):
    """Deterministic synthetic parameters matching the module's shapes."""
    C = channels
    Cq = 4 * C                  # 2**dim * channels (dim = 2)
    Ch = 2 * Cq                 # SimpleConvNet hidden width
    ks = jax.random.split(key, 8)
    # InvertibleDownsampling2D: per-channel orthogonal 4x4 (Cayley of skew weight)
    m_ds = _cayley(0.3 * jax.random.normal(ks[0], (C, 4, 4), jnp.float32))
    # ActNorm (per depth)
    an_bias = 0.1 * jax.random.normal(ks[1], (depth, Cq), jnp.float32)
    an_logs = 0.1 * jax.random.normal(ks[2], (depth, Cq), jnp.float32)
    # InvertibleChannelMixing2D: orthogonal Cq x Cq (per depth)
    m_mix = _cayley(0.3 * jax.random.normal(ks[3], (depth, Cq, Cq), jnp.float32))
    # SimpleConvNet: conv3x3(Cq->Ch) + ReLU + conv3x3(Ch->2*Cq); stored (ky,kx,Cin,Cout)
    w1 = jax.random.normal(ks[4], (depth, 3, 3, Cq, Ch), jnp.float32) / np.sqrt(9 * Cq)
    b1 = 0.01 * jax.random.normal(ks[5], (depth, Ch), jnp.float32)
    w2 = jax.random.normal(ks[6], (depth, 3, 3, Ch, 2 * Cq), jnp.float32) / np.sqrt(9 * Ch)
    b2 = 0.01 * jax.random.normal(ks[7], (depth, 2 * Cq), jnp.float32)
    # coupling scaling_factor (zero-init, like the torch module)
    sfac = jnp.zeros((depth, Cq), jnp.float32)
    # channel mask, invert=False: first half of channels = 1 (identity half)
    mask = jnp.concatenate([jnp.ones((Cq // 2,), jnp.float32),
                            jnp.zeros((Cq - Cq // 2,), jnp.float32)]).reshape(1, Cq)
    return dict(m_ds=m_ds, an_bias=an_bias, an_logs=an_logs, m_mix=m_mix,
                w1=w1, b1=b1, w2=w2, b2=b2, sfac=sfac, mask=mask)


@functools.lru_cache(maxsize=None)
def _roll_matches_numpy():
    """Calibrate pltpu.roll direction against jnp.roll once (tiny probe kernel)."""
    def probe(x_ref, o_ref):
        o_ref[...] = pltpu.roll(x_ref[...], 1, axis=1)
    x = jnp.arange(8 * 128, dtype=jnp.float32).reshape(8, 128)
    y = pl.pallas_call(probe, out_shape=jax.ShapeDtypeStruct((8, 128), jnp.float32))(x)
    return bool(jnp.array_equal(y, jnp.roll(x, 1, axis=1)))


def _flowblock_kernel(x_ref, wds_ref, tapm_ref,
                      wfold_ref, bfold_ref, w1_ref, b1_ref, w2_ref, b2_ref,
                      sfe_ref,
                      out_ref, ld_ref,
                      *, Ws, Cq2, R, roll_np):
    """Grid = (batch_blocks, depth).  One flow-depth step per invocation.

    The running (Cq, R) activation and the (1, R) running logdet rows are
    carried directly in the output blocks (their index_maps ignore the depth
    coordinate, so the blocks stay resident in VMEM across the depth axis) --
    a single store per step, no scratch double-store."""
    d = pl.program_id(1)

    @pl.when(d == 0)
    def _init():
        # InvertibleDownsampling2D == block-diagonal orthogonal channel matmul
        # on the space-to-depth squeezed input (orthogonal -> logdet 0).
        out_ref[0] = jnp.dot(wds_ref[...], x_ref[0],
                             preferred_element_type=jnp.float32)
        ld_ref[0] = jnp.zeros((1, R), jnp.float32)

    y = out_ref[0]                                                    # (Cq, R)

    # ---- ActNorm folded into InvertibleChannelMixing2D (one matmul) ----
    #   y <- Wmix @ diag(exp(logs)) @ (y + bias)  ==  Wfold @ y + bfold
    y = jnp.dot(wfold_ref[0], y, preferred_element_type=jnp.float32) + bfold_ref[0]

    # ---- AffineCouplingLayer (channel mask statically pruned) ----
    # mask = [1]*Cq2 + [0]*Cq2  =>  z = y*mask == y[:Cq2]; only the coupling
    # half of conv2's output is ever used (s/t are multiplied by 1-mask).
    z = y[:Cq2, :]                                                    # identity half

    tapms = [tapm_ref[i] for i in range(9)]                           # (1, R) each

    def im2col(a):
        # (C, R) -> (9*C, R): 3x3 'same' taps via lane rolls + boundary masks.
        # Masks also prevent cross-sample contamination along the fused
        # (batch_tile * HW) lane axis.
        pieces = []
        tap = 0
        for dy in (-1, 0, 1):
            for dx in (-1, 0, 1):
                s = dy * Ws + dx
                if s == 0:
                    pieces.append(a)                                  # center: no mask
                else:
                    shift = (-s) % R if roll_np else s % R
                    pieces.append(pltpu.roll(a, shift, axis=1) * tapms[tap])
                tap += 1
        return jnp.concatenate(pieces, axis=0)

    # conv1: 3x3 'same', Cq/2 -> Ch, single MXU matmul (K = 9*Cq/2); ReLU.
    h1 = jnp.dot(w1_ref[0], im2col(z), preferred_element_type=jnp.float32)
    h1 = jnp.maximum(h1 + b1_ref[0], 0.0)

    # conv2: 3x3 'same', Ch -> Cq pruned rows (Cq/2 s-rows + Cq/2 t-rows),
    # single MXU matmul (K = 9*Ch).  exp(-scaling_factor) is pre-folded into
    # the s-rows of w2/b2, so tanh applies directly.
    nn = jnp.dot(w2_ref[0], im2col(h1), preferred_element_type=jnp.float32)
    nn = nn + b2_ref[0]

    s = jnp.tanh(nn[:Cq2, :]) * sfe_ref[0]                            # (Cq2, R)
    y_bot = (y[Cq2:, :] + nn[Cq2:, :]) * jnp.exp(s)                   # coupling half

    # Single full-block store of the carried activation; identity half passes
    # through unchanged (it IS z after the fold).
    out_ref[0] = jnp.concatenate([z, y_bot], axis=0)
    ld_ref[0] = ld_ref[0] + jnp.sum(s, axis=0, keepdims=True)         # (1, R)


def flowblock_forward(x_nchw, logdet, params, *, depth):
    """FlowBlock.forward(h, logdet, reverse=False). x: NCHW, logdet: (N,)."""
    N, C, H, W = x_nchw.shape
    assert H % 2 == 0 and W % 2 == 0
    Hs, Ws = H // 2, W // 2
    HW = Hs * Ws
    Cq, Ch = 4 * C, 8 * C
    Cq2 = Cq // 2
    assert Cq % 2 == 0
    # Pruning relies on the standard invert=False channel mask: [1]*Cq2+[0]*Cq2.

    # Batch-tile selection: prefer (a) lane-dense R (multiple of 128 ->
    # unmasked vst), then (b) NB >= 2 blocks so v7x's two TensorCores both get
    # 'parallel' work, then (c) the widest R under a VMEM-safe lane cap.
    lane_cap = 2048
    best = None
    for bt in range(1, N + 1):
        if N % bt:
            continue
        r_c = bt * HW
        if bt > 1 and r_c > lane_cap:
            continue
        score = (r_c % 128 == 0, (N // bt) >= 2, r_c)
        if best is None or score > best[0]:
            best = (score, bt)
    Bt = best[1]
    NB = N // Bt
    R = Bt * HW

    # -- space-to-depth squeeze + channel-major (Cq, Bt*HW) layout glue --
    # channel order c*4 + (kh*2+kw) matches torch's grouped-conv output order.
    x_sq = x_nchw.reshape(N, C, Hs, 2, Ws, 2)
    x_sq = jnp.transpose(x_sq, (0, 1, 3, 5, 2, 4)).reshape(N, Cq, HW)
    x_t = x_sq.reshape(NB, Bt, Cq, HW).transpose(0, 2, 1, 3).reshape(NB, Cq, R)

    # -- parameter-derived constants (once per trace, plain JAX) --
    w_ds = jax.scipy.linalg.block_diag(
        *[params['m_ds'][c] for c in range(C)]).astype(jnp.float32)       # (Cq, Cq)
    e_logs = jnp.exp(params['an_logs'])                                   # (depth, Cq)
    wfold = params['m_mix'] * e_logs[:, None, :]                          # (depth, Cq, Cq)
    bfold = jnp.einsum('dij,dj->di', params['m_mix'],
                       e_logs * params['an_bias'])[..., None]             # (depth, Cq, 1)

    # conv1: keep only the identity-half input channels (z = y*mask).
    w1p = params['w1'][:, :, :, :Cq2, :]                                  # (d,3,3,Cq/2,Ch)
    w1t = jnp.transpose(w1p.reshape(depth, 9 * Cq2, Ch), (0, 2, 1))       # (d,Ch,9*Cq/2)
    b1 = params['b1'][..., None]                                          # (d, Ch, 1)

    # conv2: keep only the coupling-half s/t output rows; fold exp(-sfac) into
    # the s-rows so the kernel applies tanh directly.
    sfac_c = params['sfac'][:, Cq2:]                                      # (d, Cq/2)
    sfi_c = jnp.exp(-sfac_c)
    sfe_c = jnp.exp(sfac_c)[..., None]                                    # (d, Cq/2, 1)
    w2r = params['w2'].reshape(depth, 9 * Ch, 2 * Cq)
    w2_s = w2r[:, :, Cq2:Cq] * sfi_c[:, None, :]                          # s-half, folded
    w2_t = w2r[:, :, Cq + Cq2:]                                           # t-half
    w2t = jnp.transpose(jnp.concatenate([w2_s, w2_t], axis=-1), (0, 2, 1))  # (d,Cq,9*Ch)
    b2_s = params['b2'][:, Cq2:Cq] * sfi_c
    b2_t = params['b2'][:, Cq + Cq2:]
    b2 = jnp.concatenate([b2_s, b2_t], axis=-1)[..., None]                # (d, Cq, 1)

    # data-independent ActNorm logdet term (same for every sample)
    ld_act = jnp.float32(HW) * jnp.sum(params['an_logs'])

    # per-tap validity masks for the 3x3 'same' stencil (static, numpy); they
    # also block cross-sample leakage along the fused (Bt*HW) lane axis.
    tapm = np.zeros((9, 1, R), np.float32)
    tap = 0
    for dy in (-1, 0, 1):
        for dx in (-1, 0, 1):
            valid = np.zeros((Hs, Ws), np.float32)
            valid[max(0, -dy):Hs - max(0, dy), max(0, -dx):Ws - max(0, dx)] = 1.0
            tapm[tap, 0, :] = np.tile(valid.reshape(-1), Bt)
            tap += 1
    tapm = jnp.asarray(tapm)

    kernel = functools.partial(_flowblock_kernel, Ws=Ws, Cq2=Cq2, R=R,
                               roll_np=_roll_matches_numpy())

    def per_depth(*shape):
        return pl.BlockSpec((1,) + shape, lambda b, d: (d, 0, 0))

    y_t, ld_rows = pl.pallas_call(
        kernel,
        grid=(NB, depth),
        in_specs=[
            pl.BlockSpec((1, Cq, R), lambda b, d: (b, 0, 0)),   # x (squeezed, CM)
            pl.BlockSpec((Cq, Cq), lambda b, d: (0, 0)),        # downsampling matrix
            pl.BlockSpec((9, 1, R), lambda b, d: (0, 0, 0)),    # 3x3 boundary masks
            per_depth(Cq, Cq),                                  # ActNorm+mixing W
            per_depth(Cq, 1),                                   # ActNorm+mixing b
            per_depth(Ch, 9 * Cq2),                             # conv1 weights (pruned K)
            per_depth(Ch, 1),                                   # conv1 bias
            per_depth(Cq, 9 * Ch),                              # conv2 weights (pruned M)
            per_depth(Cq, 1),                                   # conv2 bias (s-rows folded)
            per_depth(Cq2, 1),                                  # exp(+scaling_factor), coupling half
        ],
        out_specs=[
            pl.BlockSpec((1, Cq, R), lambda b, d: (b, 0, 0)),   # y (carried activation)
            pl.BlockSpec((1, 1, R), lambda b, d: (b, 0, 0)),    # per-position logdet
        ],
        out_shape=[
            jax.ShapeDtypeStruct((NB, Cq, R), jnp.float32),
            jax.ShapeDtypeStruct((NB, 1, R), jnp.float32),
        ],
        compiler_params=pltpu.CompilerParams(
            dimension_semantics=("parallel", "arbitrary"),
            vmem_limit_bytes=32 * 1024 * 1024),
    )(x_t, w_ds, tapm, wfold, bfold, w1t, b1, w2t, b2, sfe_c)

    # glue back to NCHW + finish the (tiny) per-sample logdet reduction
    h_nchw = y_t.reshape(NB, Cq, Bt, HW).transpose(0, 2, 1, 3).reshape(N, Cq, Hs, Ws)
    ld_coupling = ld_rows.reshape(NB, Bt, HW).sum(axis=-1).reshape(N)
    return h_nchw, logdet + ld_act + ld_coupling


def flowblock_reference(x, logdet, params, *, depth):
    """Pure-JAX NCHW reference mirroring the PyTorch semantics."""
    N, C, H, W = x.shape
    Cq, Ch = 4 * C, 8 * C
    dn = ('NCHW', 'OIHW', 'NCHW')
    hp = jax.lax.Precision.HIGHEST
    ker = params['m_ds'].reshape(C * 4, 1, 2, 2)
    y = jax.lax.conv_general_dilated(x, ker, (2, 2), 'VALID', dimension_numbers=dn,
                                     feature_group_count=C, precision=hp)
    Hs, Ws = H // 2, W // 2
    mask = params['mask'].reshape(1, Cq, 1, 1)
    for d in range(depth):
        bias = params['an_bias'][d].reshape(1, Cq, 1, 1)
        logs = params['an_logs'][d].reshape(1, Cq, 1, 1)
        y = (y + bias) * jnp.exp(logs)
        logdet = logdet + Hs * Ws * jnp.sum(params['an_logs'][d])
        y = jax.lax.conv_general_dilated(y, params['m_mix'][d].reshape(Cq, Cq, 1, 1),
                                         (1, 1), 'VALID', dimension_numbers=dn,
                                         precision=hp)
        z_in = y * mask
        w1 = jnp.transpose(params['w1'][d], (3, 2, 0, 1))
        h1 = jax.lax.conv_general_dilated(z_in, w1, (1, 1), 'SAME',
                                          dimension_numbers=dn, precision=hp)
        h1 = jnp.maximum(h1 + params['b1'][d].reshape(1, Ch, 1, 1), 0.0)
        w2 = jnp.transpose(params['w2'][d], (3, 2, 0, 1))
        nn_out = jax.lax.conv_general_dilated(h1, w2, (1, 1), 'SAME',
                                              dimension_numbers=dn, precision=hp)
        nn_out = nn_out + params['b2'][d].reshape(1, 2 * Cq, 1, 1)
        s, t = nn_out[:, :Cq], nn_out[:, Cq:]
        s_fac = jnp.exp(params['sfac'][d]).reshape(1, Cq, 1, 1)
        s = jnp.tanh(s / s_fac) * s_fac
        s = s * (1 - mask)
        t = t * (1 - mask)
        y = (y + t) * jnp.exp(s)
        logdet = logdet + jnp.sum(s, axis=(1, 2, 3))
    return y, logdet


if __name__ == "__main__":
    channels, dim, depth = 4, 2, 2
    N, H, W = 2, 16, 16

    key = jax.random.PRNGKey(0)
    kx, kp = jax.random.split(key)
    x = jax.random.normal(kx, (N, channels, H, W), jnp.float32)       # NCHW like torch
    logdet = jnp.zeros((N,), jnp.float32)
    params = make_flowblock_params(kp, channels, depth)

    h_out, ld_out = flowblock_forward(x, logdet, params, depth=depth)
    h_out = jax.block_until_ready(h_out)
    ld_out = jax.block_until_ready(ld_out)

    assert h_out.shape == (N, 4 * channels, H // 2, W // 2)
    assert ld_out.shape == (N,)

    h_ref, ld_ref = flowblock_reference(x, logdet, params, depth=depth)
    err_h = float(jnp.max(jnp.abs(h_out - h_ref)))
    err_l = float(jnp.max(jnp.abs(ld_out - ld_ref)))
    assert err_h < 1e-2, f"h mismatch: {err_h}"
    assert err_l < 1e-1, f"logdet mismatch: {err_l}"

    print("KERNEL_OK")
</pallas_src>

<mosaic_0001>
module attributes {stable_mosaic.version = 11 : i64} {
  func.func @probe(%arg0: memref<8x128xf32, #tpu.memory_space<vmem>>, %arg1: memref<8x128xf32, #tpu.memory_space<vmem>>) attributes {dimension_semantics = [], scalar_prefetch = 0 : i64, scratch_operands = 0 : i64, tpu.core_type = #tpu.core_type<tc>} {
    %c0 = arith.constant 0 : index
    %c0_0 = arith.constant 0 : index
    %0 = vector.load %arg0[%c0, %c0_0] : memref<8x128xf32, #tpu.memory_space<vmem>>, vector<8x128xf32>
    %c1_i32 = arith.constant 1 : i32
    %1 = tpu.dynamic_rotate %0 by %c1_i32 dim 1 : vector<8x128xf32>, i32 -> vector<8x128xf32>
    %c0_1 = arith.constant 0 : index
    %c0_2 = arith.constant 0 : index
    %2 = vector.load %arg1[%c0_1, %c0_2] : memref<8x128xf32, #tpu.memory_space<vmem>>, vector<8x128xf32>
    tpu.vector_store %arg1[%c0_1, %c0_2], %1 {strides = array<i32>} : memref<8x128xf32, #tpu.memory_space<vmem>>, vector<8x128xf32>,
    return
  }
}

</mosaic_0001>

<bundles_post_ra>
// kernel: tpu_custom_call.1
= control target key start
LH: loop header
LB: loop body
LE: loop exit
PB: predicated region body
PF: predicated region fallthrough
CT: control target
= control target key end

     0   :  { %6 = vsyncpa [#allocation3], 0  ;;  %s118_s0 = inlined_call_operand.hbm [shape: f32[8,128], index: 0, kind: input, shape index: {}]   ;;  %s119_s1 = inlined_call_operand.hbm [shape: f32[8,128], index: 1, kind: output, shape index: {}]  }
   0x1   :  { %7 = vsyncpa [#allocation4], 0  ;;  %s13_s8 = sshll.u32 %s118_s0, 4  ;;  %s99_s9 = smov [#allocation2]   ;;  %s14_s8 = int_to_ptr.hbm [resolvable:$true] %s13_s8 }
   0x2   :  { %s15_s10 = sshll.u32 %s99_s9, 4  ;;  %s16_s10 = int_to_ptr.vmem [resolvable:$true] %s15_s10 }
   0x3   :  { %18 = dma.hbm_to_vmem [thread:$0]  %s14_s8, 128, %s16_s10, [#allocation3]  }
   0x4   :  { %95 = dma.done.wait [#allocation3], 128  }
   0x5   :  { %96 = vsyncadd [#allocation3], 4294967168  ;;  %v23_v0 = vld [vmem:[#allocation2] sm:$0xff]  ;;  %s100_s11 = smov 1   ;;  %s101_s12 = smov [#allocation5]  }
   0x6   :  { %24 = vrot.lane.b32.xlu0 %v23_v0, %s100_s11  ;;  %s32_s13 = sshll.u32 %s101_s12, 4  ;;  %s34_s16 = sshll.u32 %s119_s1, 4  ;;  %s33_s13 = int_to_ptr.vmem [resolvable:$true] %s32_s13  ;;  %s35_s16 = int_to_ptr.hbm [resolvable:$true] %s34_s16 }
  0x78   :  { %v25_v1 = vpop.permute.xlu0 %24 }
  0x79   :  { %26 = vst [vmem:[#allocation5] sm:$0xff] %v25_v1 }
  0x7a   :  { %37 = dma.vmem_to_hbm [thread:$0]  %s33_s13, 128, %s35_s16, [#allocation4]  }
  0x7b   :  { %97 = dma.done.wait [#allocation4], 128  }
  0x7c   :  { %98 = vsyncadd [#allocation4], 4294967168 }
  0x7d   :  { %42 = vsyncpa [#allocation3], 1 }
  0x7e   :  { %43 = vsyncpa [#allocation4], 1 }

</bundles_post_ra>
